<compile_context>
chip_gen: v7x
topology: tpu7x:2x2x1
jax: 0.10.0
libtpu: 0.0.40
codegen_flags: <defaults>
</compile_context>

<pallas_src>
import functools
import math

import jax
import jax.numpy as jnp
from jax.experimental import pallas as pl
from jax.experimental.pallas import tpu as pltpu


def _round_up(v, m):
    return (v + m - 1) // m * m


# ----------------------------- Pallas kernel --------------------------------
def _dag_encoder_kernel(x_ref, aup_ref, adn_ref, w_ref, o_ref, *,
                        dp, hp, k, act, offs):
    """Whole DAGEncoder forward in one kernel invocation.

    One DAGConv layer (features padded to Hp = 128-lane multiples):
        pre = x @ [W_msg | W_upd_x] + [b_msg | 0]   (fused x-side matmul)
        msg = act(pre[:, :Hp])                       (message(); aligned slice)
        agg = A @ msg                                (mean aggregation)
        out = act(pre[:, Hp:] + agg @ W_upd_m)       (update())
    """
    f32 = jnp.float32
    bf16 = jnp.bfloat16
    n = o_ref.shape[0]
    c = 2 * hp

    x = x_ref[...]        # [Np, Dp]  bf16
    a_up = aup_ref[...]   # [Np, Np]  bf16
    a_dn = adn_ref[...]   # [Np, Np]  bf16

    # Bias rows (one 8-row block in the packed slab), elementwise math in f32.
    bias = w_ref[offs["bias"]:offs["bias"] + 8, :].astype(f32)   # [8, 2Hp]

    def conv(pre, a, wm):
        # pre: [Np, 2Hp] f32 (x-side matmul + bias already applied)
        msg = act(pre[:, :hp])                                           # [Np, Hp]
        agg = jnp.dot(a, msg.astype(bf16), preferred_element_type=f32)   # [Np, Hp]
        upd = pre[:, hp:] + jnp.dot(agg.astype(bf16), wm,
                                    preferred_element_type=f32)
        return act(upd)                                                  # [Np, Hp] f32

    # ---- layer 1: up (source->target) and down (target->source) branches ----
    wx_u1 = w_ref[offs["wx_u1"]:offs["wx_u1"] + dp, :]       # [Dp, 2Hp] bf16
    wx_d1 = w_ref[offs["wx_d1"]:offs["wx_d1"] + dp, :]
    wm_u1 = w_ref[offs["wm_u1"]:offs["wm_u1"] + hp, :hp]     # [Hp, Hp]  bf16
    wm_d1 = w_ref[offs["wm_d1"]:offs["wm_d1"] + hp, :hp]

    xu = conv(jnp.dot(x, wx_u1, preferred_element_type=f32) + bias[0:1, :],
              a_up, wm_u1)
    xd = conv(jnp.dot(x, wx_d1, preferred_element_type=f32) + bias[1:2, :],
              a_dn, wm_d1)

    # ---- layers 2..k: the reference applies up_conv2 (and the up adjacency)
    # to BOTH branches, so the halves are identical -> compute once (dedup).
    if k >= 2:
        wx2_u = w_ref[offs["wx2_u"]:offs["wx2_u"] + hp, :]   # acts on xu half
        wx2_d = w_ref[offs["wx2_d"]:offs["wx2_d"] + hp, :]   # acts on xd half
        wm_2 = w_ref[offs["wm_2"]:offs["wm_2"] + hp, :hp]
        # hoist the bias broadcast out of the unrolled loop (no CSE in JAX)
        b2 = jnp.broadcast_to(bias[2:3, :], (n, c))

        # first loop iteration: x = [xu | xd] -- the concat is never built
        pre = (jnp.dot(xu.astype(bf16), wx2_u, preferred_element_type=f32)
               + jnp.dot(xd.astype(bf16), wx2_d, preferred_element_type=f32)
               + b2)
        xu = conv(pre, a_up, wm_2)

        if k >= 3:
            # both halves identical from here on: fold [xu | xu] into the
            # summed weight (half the K-dim, no concat).
            wx2_sum = (wx2_u.astype(f32) + wx2_d.astype(f32)).astype(bf16)
            for _ in range(k - 2):
                pre = jnp.dot(xu.astype(bf16), wx2_sum,
                              preferred_element_type=f32) + b2
                xu = conv(pre, a_up, wm_2)
        xd = xu

    # Lane-dense output: two stores at 128-aligned column offsets (no concat).
    o_ref[:, :hp] = xu
    o_ref[:, hp:] = xd


# --------------------------- host-side helpers --------------------------------
def build_mean_adj(src, dst, n_pad):
    """A[i, j] = 1/indeg(i) if there is a message j -> i; nodes with no
    incoming messages (and padded nodes) get an all-zero row (matches PyG
    scatter-mean). Returned in bf16 for the MXU; built in f32."""
    counts = jnp.zeros((n_pad, n_pad), jnp.float32).at[dst, src].add(1.0)
    deg = counts.sum(axis=1, keepdims=True)
    return (counts / jnp.maximum(deg, 1.0)).astype(jnp.bfloat16)


def init_dagconv_params(key, in_dim, h):
    """Deterministic init mimicking nn.Linear shapes (weights stored transposed
    as [in, out]). updater_linear ([H, in_dim+H] in torch, no bias) is split
    into the block acting on x (wu_x) and the block acting on the agg (wu_m)."""
    k1, k2, k3, k4 = jax.random.split(key, 4)
    bound1 = 1.0 / math.sqrt(in_dim)
    bound2 = 1.0 / math.sqrt(in_dim + h)
    return {
        "w1":   jax.random.uniform(k1, (in_dim, h), jnp.float32, -bound1, bound1),
        "b1":   jax.random.uniform(k2, (1, h),      jnp.float32, -bound1, bound1),
        "wu_x": jax.random.uniform(k3, (in_dim, h), jnp.float32, -bound2, bound2),
        "wu_m": jax.random.uniform(k4, (h, h),      jnp.float32, -bound2, bound2),
    }


def pack_params(params, d, h, dp, hp):
    """Pack all weights/biases into one bf16 slab [2*Dp + 5*Hp + 8, 2*Hp].

    Each x-side block is the fused [W_msg | W_upd_x] with both output halves
    padded to Hp lanes (so in-kernel slices land on 128-lane boundaries).
    Layer-2 weights are split by which half of [xu | xd] their rows act on.
    """
    c = 2 * hp
    offs = {
        "wx_u1": 0,
        "wx_d1": dp,
        "wx2_u": 2 * dp,
        "wx2_d": 2 * dp + hp,
        "wm_u1": 2 * dp + 2 * hp,
        "wm_d1": 2 * dp + 3 * hp,
        "wm_2":  2 * dp + 4 * hp,
        "bias":  2 * dp + 5 * hp,
    }
    rows = 2 * dp + 5 * hp + 8
    slab = jnp.zeros((rows, c), jnp.float32)

    def put_fused_x(slab, r, w_msg, w_upd_x):
        nrows = w_msg.shape[0]
        slab = slab.at[r:r + nrows, 0:h].set(w_msg)
        slab = slab.at[r:r + nrows, hp:hp + h].set(w_upd_x)
        return slab

    # Layer 1 (in_dim = d)
    slab = put_fused_x(slab, offs["wx_u1"], params["up1"]["w1"], params["up1"]["wu_x"])
    slab = put_fused_x(slab, offs["wx_d1"], params["down1"]["w1"], params["down1"]["wu_x"])
    # Layer 2 (in_dim = 2h), split rows by input half
    p2 = params["up2"]
    slab = put_fused_x(slab, offs["wx2_u"], p2["w1"][:h], p2["wu_x"][:h])
    slab = put_fused_x(slab, offs["wx2_d"], p2["w1"][h:], p2["wu_x"][h:])
    # Updater message-side weights
    slab = slab.at[offs["wm_u1"]:offs["wm_u1"] + h, 0:h].set(params["up1"]["wu_m"])
    slab = slab.at[offs["wm_d1"]:offs["wm_d1"] + h, 0:h].set(params["down1"]["wu_m"])
    slab = slab.at[offs["wm_2"]:offs["wm_2"] + h, 0:h].set(p2["wu_m"])
    # Biases (message linear only; updater has no bias)
    slab = slab.at[offs["bias"] + 0, 0:h].set(params["up1"]["b1"][0])
    slab = slab.at[offs["bias"] + 1, 0:h].set(params["down1"]["b1"][0])
    slab = slab.at[offs["bias"] + 2, 0:h].set(p2["b1"][0])

    return slab.astype(jnp.bfloat16), offs


def dag_encoder(x, edge_index, params, k, act):
    n, d = x.shape
    h = params["up1"]["w1"].shape[1]
    hp = _round_up(h, 128)     # pad message width to full 128-lane tiles
    dp = _round_up(d, 128)     # pad input width (lane-dense x, uniform slab)
    n_pad = _round_up(n, 8)    # pad node axis to full sublane tiles

    src, dst = edge_index[0], edge_index[1]
    a_up = build_mean_adj(src, dst, n_pad)    # flow='source_to_target'
    a_dn = build_mean_adj(dst, src, n_pad)    # flow='target_to_source'

    x_pad = jnp.zeros((n_pad, dp), jnp.bfloat16).at[:n, :d].set(
        x.astype(jnp.bfloat16))

    slab, offs = pack_params(params, d, h, dp, hp)

    # Size the scoped VMEM limit to the actual residency (defaults are far
    # below physical; v7x physical is only 64 MiB).
    op_bytes = 2 * (x_pad.size + a_up.size + a_dn.size + slab.size) \
        + 4 * n_pad * 2 * hp
    vmem_limit = int(min(64 * 2**20, max(2 * op_bytes, 16 * 2**20)))

    # Everything is tiny at these shapes: keep all operands whole-array
    # resident in VMEM, single grid point, one lane-dense HBM write.
    # TODO(synk): for large N, tile as grid=(N/tm, N/tk) with the message-
    # source reduction axis last ("arbitrary") and the node-row axis
    # "parallel" (2 TCs on v7x), node-axis blocks >= 512, an f32 VMEM
    # accumulator for agg (init/finalize via pl.when), constant index_maps so
    # the weight slab stays VMEM-resident, and scalar-prefetched block masks
    # to skip all-zero adjacency tiles (DAG sparsity) so the dense [N, N]
    # adjacency never has to fit in VMEM.
    vmem = pl.BlockSpec(memory_space=pltpu.MemorySpace.VMEM)
    out_pad = pl.pallas_call(
        functools.partial(_dag_encoder_kernel,
                          dp=dp, hp=hp, k=k, act=act, offs=offs),
        out_shape=jax.ShapeDtypeStruct((n_pad, 2 * hp), jnp.float32),
        in_specs=[vmem, vmem, vmem, vmem],
        out_specs=vmem,
        compiler_params=pltpu.CompilerParams(vmem_limit_bytes=vmem_limit),
    )(x_pad, a_up, a_dn, slab)

    # Strip the lane/sublane padding: real features live in lanes [0, h) of
    # each Hp-wide half.
    return jnp.concatenate([out_pad[:n, :h], out_pad[:n, hp:hp + h]], axis=1)


# --------------------------------- main --------------------------------------
if __name__ == "__main__":
    N, IN_DIM, OUT_DIM, K = 8, 16, 32, 3
    H = OUT_DIM // 2
    act = lambda v: jnp.maximum(v, 0.0)  # act='relu'

    key = jax.random.PRNGKey(0)
    kx, k_up1, k_dn1, k_up2, k_dn2 = jax.random.split(key, 5)

    x = jax.random.normal(kx, (N, IN_DIM), jnp.float32)
    # a small DAG on 8 nodes
    edge_index = jnp.array(
        [[0, 0, 1, 2, 3, 4, 4, 5, 6],
         [1, 2, 3, 3, 4, 5, 6, 7, 7]], dtype=jnp.int32)

    params = {
        "up1":   init_dagconv_params(k_up1, IN_DIM, H),
        "down1": init_dagconv_params(k_dn1, IN_DIM, H),
        "up2":   init_dagconv_params(k_up2, OUT_DIM, H),
        "down2": init_dagconv_params(k_dn2, OUT_DIM, H),  # created, unused (matches reference)
    }

    out = dag_encoder(x, edge_index, params, K, act)
    jax.block_until_ready(out)
    assert out.shape == (N, OUT_DIM), out.shape
    assert bool(jnp.isfinite(out).all())
    print("KERNEL_OK")
</pallas_src>

<mosaic_0001>
module attributes {stable_mosaic.version = 11 : i64} {
  func.func @_dag_encoder_kernel(%arg0: memref<8x128xbf16, #tpu.memory_space<vmem>>, %arg1: memref<8x8xbf16, #tpu.memory_space<vmem>>, %arg2: memref<8x8xbf16, #tpu.memory_space<vmem>>, %arg3: memref<904x256xbf16, #tpu.memory_space<vmem>>, %arg4: memref<8x256xf32, #tpu.memory_space<vmem>>) attributes {dimension_semantics = [], scalar_prefetch = 0 : i64, scratch_operands = 0 : i64, tpu.core_type = #tpu.core_type<tc>} {
    %c0 = arith.constant 0 : index
    %c0_0 = arith.constant 0 : index
    %0 = vector.load %arg0[%c0, %c0_0] : memref<8x128xbf16, #tpu.memory_space<vmem>>, vector<8x128xbf16>
    %c0_1 = arith.constant 0 : index
    %c0_2 = arith.constant 0 : index
    %1 = vector.load %arg1[%c0_1, %c0_2] : memref<8x8xbf16, #tpu.memory_space<vmem>>, vector<8x8xbf16>
    %c0_3 = arith.constant 0 : index
    %c0_4 = arith.constant 0 : index
    %2 = vector.load %arg2[%c0_3, %c0_4] : memref<8x8xbf16, #tpu.memory_space<vmem>>, vector<8x8xbf16>
    %c896 = arith.constant 896 : index
    %c0_5 = arith.constant 0 : index
    %3 = vector.load %arg3[%c896, %c0_5] : memref<904x256xbf16, #tpu.memory_space<vmem>>, vector<8x256xbf16>
    %4 = arith.extf %3 : vector<8x256xbf16> to vector<8x256xf32>
    %c0_6 = arith.constant 0 : index
    %c0_7 = arith.constant 0 : index
    %5 = vector.load %arg3[%c0_6, %c0_7] : memref<904x256xbf16, #tpu.memory_space<vmem>>, vector<128x256xbf16>
    %c128 = arith.constant 128 : index
    %c0_8 = arith.constant 0 : index
    %6 = vector.load %arg3[%c128, %c0_8] : memref<904x256xbf16, #tpu.memory_space<vmem>>, vector<128x256xbf16>
    %c512 = arith.constant 512 : index
    %c0_9 = arith.constant 0 : index
    %7 = vector.load %arg3[%c512, %c0_9] : memref<904x256xbf16, #tpu.memory_space<vmem>>, vector<128x128xbf16>
    %c640 = arith.constant 640 : index
    %c0_10 = arith.constant 0 : index
    %8 = vector.load %arg3[%c640, %c0_10] : memref<904x256xbf16, #tpu.memory_space<vmem>>, vector<128x128xbf16>
    %cst = arith.constant dense<0.000000e+00> : vector<8x256xf32>
    %9 = tpu.matmul %0, %5, %cst {dimension_numbers = #tpu.dot_dimension_numbers<[1], [0], [0], [1], [0, 0, 1, 1], [], []>} : vector<8x128xbf16>, vector<128x256xbf16>, vector<8x256xf32> -> vector<8x256xf32>
    %10 = vector.extract_strided_slice %4 {offsets = [0, 0], sizes = [1, 256], strides = [1, 1]} : vector<8x256xf32> to vector<1x256xf32>
    %11 = vector.broadcast %10 : vector<1x256xf32> to vector<8x256xf32>
    %12 = arith.addf %9, %11 : vector<8x256xf32>
    %13 = vector.extract_strided_slice %12 {offsets = [0, 0], sizes = [8, 128], strides = [1, 1]} : vector<8x256xf32> to vector<8x128xf32>
    %cst_11 = arith.constant 0.000000e+00 : f32
    %14 = vector.broadcast %cst_11 : f32 to vector<8x128xf32>
    %15 = arith.maximumf %13, %14 : vector<8x128xf32>
    %16 = arith.truncf %15 : vector<8x128xf32> to vector<8x128xbf16>
    %cst_12 = arith.constant dense<0.000000e+00> : vector<8x128xf32>
    %17 = tpu.matmul %1, %16, %cst_12 {dimension_numbers = #tpu.dot_dimension_numbers<[1], [0], [0], [1], [0, 0, 1, 1], [], []>} : vector<8x8xbf16>, vector<8x128xbf16>, vector<8x128xf32> -> vector<8x128xf32>
    %18 = vector.extract_strided_slice %12 {offsets = [0, 128], sizes = [8, 128], strides = [1, 1]} : vector<8x256xf32> to vector<8x128xf32>
    %19 = arith.truncf %17 : vector<8x128xf32> to vector<8x128xbf16>
    %cst_13 = arith.constant dense<0.000000e+00> : vector<8x128xf32>
    %20 = tpu.matmul %19, %7, %cst_13 {dimension_numbers = #tpu.dot_dimension_numbers<[1], [0], [0], [1], [0, 0, 1, 1], [], []>} : vector<8x128xbf16>, vector<128x128xbf16>, vector<8x128xf32> -> vector<8x128xf32>
    %21 = arith.addf %18, %20 : vector<8x128xf32>
    %cst_14 = arith.constant 0.000000e+00 : f32
    %22 = vector.broadcast %cst_14 : f32 to vector<8x128xf32>
    %23 = arith.maximumf %21, %22 : vector<8x128xf32>
    %cst_15 = arith.constant dense<0.000000e+00> : vector<8x256xf32>
    %24 = tpu.matmul %0, %6, %cst_15 {dimension_numbers = #tpu.dot_dimension_numbers<[1], [0], [0], [1], [0, 0, 1, 1], [], []>} : vector<8x128xbf16>, vector<128x256xbf16>, vector<8x256xf32> -> vector<8x256xf32>
    %25 = vector.extract_strided_slice %4 {offsets = [1, 0], sizes = [1, 256], strides = [1, 1]} : vector<8x256xf32> to vector<1x256xf32>
    %26 = vector.broadcast %25 : vector<1x256xf32> to vector<8x256xf32>
    %27 = arith.addf %24, %26 : vector<8x256xf32>
    %28 = vector.extract_strided_slice %27 {offsets = [0, 0], sizes = [8, 128], strides = [1, 1]} : vector<8x256xf32> to vector<8x128xf32>
    %cst_16 = arith.constant 0.000000e+00 : f32
    %29 = vector.broadcast %cst_16 : f32 to vector<8x128xf32>
    %30 = arith.maximumf %28, %29 : vector<8x128xf32>
    %31 = arith.truncf %30 : vector<8x128xf32> to vector<8x128xbf16>
    %cst_17 = arith.constant dense<0.000000e+00> : vector<8x128xf32>
    %32 = tpu.matmul %2, %31, %cst_17 {dimension_numbers = #tpu.dot_dimension_numbers<[1], [0], [0], [1], [0, 0, 1, 1], [], []>} : vector<8x8xbf16>, vector<8x128xbf16>, vector<8x128xf32> -> vector<8x128xf32>
    %33 = vector.extract_strided_slice %27 {offsets = [0, 128], sizes = [8, 128], strides = [1, 1]} : vector<8x256xf32> to vector<8x128xf32>
    %34 = arith.truncf %32 : vector<8x128xf32> to vector<8x128xbf16>
    %cst_18 = arith.constant dense<0.000000e+00> : vector<8x128xf32>
    %35 = tpu.matmul %34, %8, %cst_18 {dimension_numbers = #tpu.dot_dimension_numbers<[1], [0], [0], [1], [0, 0, 1, 1], [], []>} : vector<8x128xbf16>, vector<128x128xbf16>, vector<8x128xf32> -> vector<8x128xf32>
    %36 = arith.addf %33, %35 : vector<8x128xf32>
    %cst_19 = arith.constant 0.000000e+00 : f32
    %37 = vector.broadcast %cst_19 : f32 to vector<8x128xf32>
    %38 = arith.maximumf %36, %37 : vector<8x128xf32>
    %c256 = arith.constant 256 : index
    %c0_20 = arith.constant 0 : index
    %39 = vector.load %arg3[%c256, %c0_20] : memref<904x256xbf16, #tpu.memory_space<vmem>>, vector<128x256xbf16>
    %c384 = arith.constant 384 : index
    %c0_21 = arith.constant 0 : index
    %40 = vector.load %arg3[%c384, %c0_21] : memref<904x256xbf16, #tpu.memory_space<vmem>>, vector<128x256xbf16>
    %c768 = arith.constant 768 : index
    %c0_22 = arith.constant 0 : index
    %41 = vector.load %arg3[%c768, %c0_22] : memref<904x256xbf16, #tpu.memory_space<vmem>>, vector<128x128xbf16>
    %42 = vector.extract_strided_slice %4 {offsets = [2, 0], sizes = [1, 256], strides = [1, 1]} : vector<8x256xf32> to vector<1x256xf32>
    %43 = vector.shape_cast %42 : vector<1x256xf32> to vector<1x256xf32>
    %44 = vector.broadcast %43 : vector<1x256xf32> to vector<8x256xf32>
    %45 = arith.truncf %23 : vector<8x128xf32> to vector<8x128xbf16>
    %cst_23 = arith.constant dense<0.000000e+00> : vector<8x256xf32>
    %46 = tpu.matmul %45, %39, %cst_23 {dimension_numbers = #tpu.dot_dimension_numbers<[1], [0], [0], [1], [0, 0, 1, 1], [], []>} : vector<8x128xbf16>, vector<128x256xbf16>, vector<8x256xf32> -> vector<8x256xf32>
    %47 = arith.truncf %38 : vector<8x128xf32> to vector<8x128xbf16>
    %cst_24 = arith.constant dense<0.000000e+00> : vector<8x256xf32>
    %48 = tpu.matmul %47, %40, %cst_24 {dimension_numbers = #tpu.dot_dimension_numbers<[1], [0], [0], [1], [0, 0, 1, 1], [], []>} : vector<8x128xbf16>, vector<128x256xbf16>, vector<8x256xf32> -> vector<8x256xf32>
    %49 = arith.addf %46, %48 : vector<8x256xf32>
    %50 = arith.addf %49, %44 : vector<8x256xf32>
    %51 = vector.extract_strided_slice %50 {offsets = [0, 0], sizes = [8, 128], strides = [1, 1]} : vector<8x256xf32> to vector<8x128xf32>
    %cst_25 = arith.constant 0.000000e+00 : f32
    %52 = vector.broadcast %cst_25 : f32 to vector<8x128xf32>
    %53 = arith.maximumf %51, %52 : vector<8x128xf32>
    %54 = arith.truncf %53 : vector<8x128xf32> to vector<8x128xbf16>
    %cst_26 = arith.constant dense<0.000000e+00> : vector<8x128xf32>
    %55 = tpu.matmul %1, %54, %cst_26 {dimension_numbers = #tpu.dot_dimension_numbers<[1], [0], [0], [1], [0, 0, 1, 1], [], []>} : vector<8x8xbf16>, vector<8x128xbf16>, vector<8x128xf32> -> vector<8x128xf32>
    %56 = vector.extract_strided_slice %50 {offsets = [0, 128], sizes = [8, 128], strides = [1, 1]} : vector<8x256xf32> to vector<8x128xf32>
    %57 = arith.truncf %55 : vector<8x128xf32> to vector<8x128xbf16>
    %cst_27 = arith.constant dense<0.000000e+00> : vector<8x128xf32>
    %58 = tpu.matmul %57, %41, %cst_27 {dimension_numbers = #tpu.dot_dimension_numbers<[1], [0], [0], [1], [0, 0, 1, 1], [], []>} : vector<8x128xbf16>, vector<128x128xbf16>, vector<8x128xf32> -> vector<8x128xf32>
    %59 = arith.addf %56, %58 : vector<8x128xf32>
    %cst_28 = arith.constant 0.000000e+00 : f32
    %60 = vector.broadcast %cst_28 : f32 to vector<8x128xf32>
    %61 = arith.maximumf %59, %60 : vector<8x128xf32>
    %62 = arith.extf %39 : vector<128x256xbf16> to vector<128x256xf32>
    %63 = arith.extf %40 : vector<128x256xbf16> to vector<128x256xf32>
    %64 = arith.addf %62, %63 : vector<128x256xf32>
    %65 = arith.truncf %64 : vector<128x256xf32> to vector<128x256xbf16>
    %66 = arith.truncf %61 : vector<8x128xf32> to vector<8x128xbf16>
    %cst_29 = arith.constant dense<0.000000e+00> : vector<8x256xf32>
    %67 = tpu.matmul %66, %65, %cst_29 {dimension_numbers = #tpu.dot_dimension_numbers<[1], [0], [0], [1], [0, 0, 1, 1], [], []>} : vector<8x128xbf16>, vector<128x256xbf16>, vector<8x256xf32> -> vector<8x256xf32>
    %68 = arith.addf %67, %44 : vector<8x256xf32>
    %69 = vector.extract_strided_slice %68 {offsets = [0, 0], sizes = [8, 128], strides = [1, 1]} : vector<8x256xf32> to vector<8x128xf32>
    %cst_30 = arith.constant 0.000000e+00 : f32
    %70 = vector.broadcast %cst_30 : f32 to vector<8x128xf32>
    %71 = arith.maximumf %69, %70 : vector<8x128xf32>
    %72 = arith.truncf %71 : vector<8x128xf32> to vector<8x128xbf16>
    %cst_31 = arith.constant dense<0.000000e+00> : vector<8x128xf32>
    %73 = tpu.matmul %1, %72, %cst_31 {dimension_numbers = #tpu.dot_dimension_numbers<[1], [0], [0], [1], [0, 0, 1, 1], [], []>} : vector<8x8xbf16>, vector<8x128xbf16>, vector<8x128xf32> -> vector<8x128xf32>
    %74 = vector.extract_strided_slice %68 {offsets = [0, 128], sizes = [8, 128], strides = [1, 1]} : vector<8x256xf32> to vector<8x128xf32>
    %75 = arith.truncf %73 : vector<8x128xf32> to vector<8x128xbf16>
    %cst_32 = arith.constant dense<0.000000e+00> : vector<8x128xf32>
    %76 = tpu.matmul %75, %41, %cst_32 {dimension_numbers = #tpu.dot_dimension_numbers<[1], [0], [0], [1], [0, 0, 1, 1], [], []>} : vector<8x128xbf16>, vector<128x128xbf16>, vector<8x128xf32> -> vector<8x128xf32>
    %77 = arith.addf %74, %76 : vector<8x128xf32>
    %cst_33 = arith.constant 0.000000e+00 : f32
    %78 = vector.broadcast %cst_33 : f32 to vector<8x128xf32>
    %79 = arith.maximumf %77, %78 : vector<8x128xf32>
    %c0_34 = arith.constant 0 : index
    %c0_35 = arith.constant 0 : index
    %80 = vector.load %arg4[%c0_34, %c0_35] : memref<8x256xf32, #tpu.memory_space<vmem>>, vector<8x128xf32>
    tpu.vector_store %arg4[%c0_34, %c0_35], %79 {strides = array<i32>} : memref<8x256xf32, #tpu.memory_space<vmem>>, vector<8x128xf32>,
    %c0_36 = arith.constant 0 : index
    %c128_37 = arith.constant 128 : index
    %81 = vector.load %arg4[%c0_36, %c128_37] : memref<8x256xf32, #tpu.memory_space<vmem>>, vector<8x128xf32>
    tpu.vector_store %arg4[%c0_36, %c128_37], %79 {strides = array<i32>} : memref<8x256xf32, #tpu.memory_space<vmem>>, vector<8x128xf32>,
    return
  }
}

</mosaic_0001>

<bundles_post_ra>
// kernel: tpu_custom_call.1
= control target key start
LH: loop header
LB: loop body
LE: loop exit
PB: predicated region body
PF: predicated region fallthrough
CT: control target
= control target key end

     0   :  { %9 = vsyncpa [#allocation3], 0  ;;  %s2232_s0 = inlined_call_operand.hbm [shape: bf16[8,128], index: 0, kind: input, shape index: {}]   ;;  %s2233_s1 = inlined_call_operand.hbm [shape: bf16[8,8], index: 1, kind: input, shape index: {}]   ;;  %s2234_s2 = inlined_call_operand.vmem [shape: bf16[8,8], index: 2, kind: input, shape index: {}]   ;;  %s2235_s3 = inlined_call_operand.hbm [shape: bf16[904,256], index: 3, kind: input, shape index: {}]   ;;  %s2236_s4 = inlined_call_operand.hbm [shape: f32[8,256], index: 4, kind: output, shape index: {}]  }
   0x1   :  { %10 = vsyncpa [#allocation6], 0 }
   0x2   :  { %11 = vsyncpa [#allocation4], 0  ;;  %s1809_s15 = smov [#allocation5]   ;;  %s1810_s17 = smov [#allocation2]  }
   0x3   :  { %s28_s16 = sshll.u32 %s1809_s15, 4  ;;  %s18_s18 = sshll.u32 %s1810_s17, 4  ;;  %s29_s16 = int_to_ptr.vmem [resolvable:$true] %s28_s16  ;;  %s19_s18 = int_to_ptr.vmem [resolvable:$true] %s18_s18 }
   0x4   :  { %s1715_s21 = scalar_lea.hbm %s2233_s1, 64 }
   0x5   :  { %p1716_p0 = scmp.ne.s32.totalorder %s2233_s1, %s1715_s21  ;;  %p1719_p1 = scmp.lt.u32.totalorder %s1715_s21, %s2233_s1 }
   0x7   :  { %p1721_p2 = pnand %p1719_p1, %p1716_p0 }
   0x9   :  { %1724 = shalt.err (!%p1721_p2)
}
   0xa   :  { %s1725_s26 = scalar_lea.vmem %s29_s16, 64  ;;  %p1730_p4 = scmp.lt.s32.totalorder %s29_s16, %s29_s16 }
   0xb   :  { %p1726_p3 = scmp.ne.s32.totalorder %s29_s16, %s1725_s26  ;;  %p1731_p5 = scmp.lt.s32.totalorder %s1725_s26, %s1725_s26 }
   0xd   :  { %p1732_p6 = por %p1731_p5, %p1730_p4 }
   0xf   :  { %p1733_p7 = pnand %p1732_p6, %p1726_p3 }
  0x11   :  { %1736 = shalt.err (!%p1733_p7)
}
  0x12   :  { %31 = dma.hbm_to_vmem [thread:$0]  %s2233_s1, 64, %s29_s16, [#allocation6]  }
  0x13   :  { %s1737_s5 = scalar_lea.hbm %s2232_s0, 64 }
  0x14   :  { %p1738_p8 = scmp.ne.s32.totalorder %s2232_s0, %s1737_s5  ;;  %p1741_p9 = scmp.lt.u32.totalorder %s1737_s5, %s2232_s0 }
  0x16   :  { %p1743_p10 = pnand %p1741_p9, %p1738_p8 }
  0x18   :  { %1746 = shalt.err (!%p1743_p10)
}
  0x19   :  { %s1747_s10 = scalar_lea.vmem %s19_s18, 64  ;;  %p1752_p12 = scmp.lt.s32.totalorder %s19_s18, %s19_s18 }
  0x1a   :  { %p1748_p11 = scmp.ne.s32.totalorder %s19_s18, %s1747_s10  ;;  %p1753_p13 = scmp.lt.s32.totalorder %s1747_s10, %s1747_s10 }
  0x1c   :  { %p1754_p0 = por %p1753_p13, %p1752_p12 }
  0x1e   :  { %p1755_p1 = pnand %p1754_p0, %p1748_p11 }
  0x20   :  { %1758 = shalt.err (!%p1755_p1)
}
  0x21   :  { %21 = dma.hbm_to_vmem [thread:$0]  %s2232_s0, 64, %s19_s18, [#allocation3]  }
  0x22   :  { %s1811_s12 = smov [#allocation7]   ;;  %s1759_s16 = scalar_lea.hbm %s2235_s3, 14464 }
  0x23   :  { %s39_s13 = sshll.u32 %s1811_s12, 4  ;;  %p1760_p2 = scmp.ne.s32.totalorder %s2235_s3, %s1759_s16  ;;  %s40_s13 = int_to_ptr.vmem [resolvable:$true] %s39_s13 }
  0x24   :  { %p1763_p3 = scmp.lt.u32.totalorder %s1759_s16, %s2235_s3 }
  0x26   :  { %p1765_p4 = pnand %p1763_p3, %p1760_p2 }
  0x28   :  { %1768 = shalt.err (!%p1765_p4)
}
  0x29   :  { %s1769_s22 = scalar_lea.vmem %s40_s13, 14464  ;;  %p1774_p6 = scmp.lt.s32.totalorder %s40_s13, %s40_s13 }
  0x2a   :  { %p1770_p5 = scmp.ne.s32.totalorder %s40_s13, %s1769_s22  ;;  %p1775_p7 = scmp.lt.s32.totalorder %s1769_s22, %s1769_s22 }
  0x2c   :  { %p1776_p8 = por %p1775_p7, %p1774_p6 }
  0x2e   :  { %p1777_p9 = pnand %p1776_p8, %p1770_p5 }
  0x30   :  { %1780 = shalt.err (!%p1777_p9)
}
  0x31   :  { %s1812_s0 = smov 128   ;;  %s1813_s18 = smov 8  }
  0x32   :  { %45 = dma.hbm_to_vmem [thread:$0]  %s2235_s3, 14464, %s40_s13, [#allocation6], %s1812_s0, %s1812_s0, %s1813_s18  }
  0x33   :  { %1803 = dma.done.wait [#allocation3], 64  }
  0x34   :  { %1804 = vsyncadd [#allocation3], 4294967232 }
  0x35   :  { %1805 = dma.done.wait [#allocation6], 14528  }
  0x36   :  { %1806 = vsyncadd [#allocation6], 4294952768  ;;  %v1814_v0 = vmov 0   ;;  %v1611_v1 = vld [vmem:[#allocation7 + $0x4] ss:$8 sps:$4 sm:$0xff]   ;;  %v1815_v18 = vmov 0.0   ;;  %v126_v26 = vlaneseq }
  0x37   :  { %246 = vmatprep.mubr.bf16.mxu0 %v1814_v0  ;;  %v1613_v2 = vld [vmem:[#allocation7] ss:$8 sps:$4 sm:$0xff]   ;;  %214 = vmatprep.subr.bf16.mxu0 %v1611_v1  ;;  %v1614_v3 = vld [vmem:[#allocation7 + $0x14] ss:$8 sps:$4 sm:$0xff]   ;;  %v1616_v4 = vld [vmem:[#allocation7 + $0x10] ss:$8 sps:$4 sm:$0xff]  }
  0x38   :  { %215 = vmatpush1.bf16.msra.mxu0 %v1613_v2  ;;  %v1617_v5 = vld [vmem:[#allocation7 + $0x24] ss:$8 sps:$4 sm:$0xff]   ;;  %v1619_v6 = vld [vmem:[#allocation7 + $0x20] ss:$8 sps:$4 sm:$0xff]   ;;  %v1620_v7 = vld [vmem:[#allocation7 + $0x34] ss:$8 sps:$4 sm:$0xff]   ;;  %1504 = vmatprep.subr.bf16.mxu1 %v1815_v18 }
  0x39   :  { %216 = vmatprep.subr.bf16.mxu0 %v1614_v3  ;;  %v1622_v8 = vld [vmem:[#allocation7 + $0x30] ss:$8 sps:$4 sm:$0xff]   ;;  %v1623_v9 = vld [vmem:[#allocation7 + $0x44] ss:$8 sps:$4 sm:$0xff]   ;;  %v1625_v10 = vld [vmem:[#allocation7 + $0x40] ss:$8 sps:$4 sm:$0xff]  }
  0x3a   :  { %v1626_v11 = vld [vmem:[#allocation7 + $0x54] ss:$8 sps:$4 sm:$0xff]   ;;  %v1628_v12 = vld [vmem:[#allocation7 + $0x50] ss:$8 sps:$4 sm:$0xff]   ;;  %v1629_v13 = vld [vmem:[#allocation7 + $0x64] ss:$8 sps:$4 sm:$0xff]  }
  0x3b   :  { %v1631_v14 = vld [vmem:[#allocation7 + $0x60] ss:$8 sps:$4 sm:$0xff]   ;;  %v1632_v15 = vld [vmem:[#allocation7 + $0x74] ss:$8 sps:$4 sm:$0xff]   ;;  %v1634_v16 = vld [vmem:[#allocation7 + $0x70] ss:$8 sps:$4 sm:$0xff]  }
  0x3c   :  { %217 = vmatpush1.bf16.msra.mxu0 %v1616_v4  ;;  %v1880_v17 = vld [vmem:[#allocation2] sm:$0xf]  ;;  %vm1816_vm0 = vmmov 0   ;;  %v1659_v19 = vld [vmem:[#allocation7 + $0x200] ss:$8 sps:$4 sm:$0xff]   ;;  %v1896_v27 = vshrl.u32 %v126_v26, 7 }
  0x3d   :  { %218 = vmatprep.subr.bf16.mxu0 %v1617_v5  ;;  %1520 = vmatprep.mubr.msk.bf16.mxu1 %vm1816_vm0, %v1815_v18  ;;  %v1660_v20 = vld [vmem:[#allocation7 + $0x210] ss:$8 sps:$4 sm:$0xff]   ;;  %v1661_v21 = vld [vmem:[#allocation7 + $0x220] ss:$8 sps:$4 sm:$0xff]   ;;  %vm261_vm1 = vcmask 1043456   ;;  %vm257_vm2 = vcmask 64512  }
  0x3e   :  { %1505 = vmatpush3.bf16.msra.mxu1 %v1659_v19  ;;  %v1662_v22 = vld [vmem:[#allocation7 + $0x230] ss:$8 sps:$4 sm:$0xff]   ;;  %v1663_v23 = vld [vmem:[#allocation7 + $0x240] ss:$8 sps:$4 sm:$0xff]   ;;  %v128_v30 = vsub.s32 0, %v1896_v27  ;;  %v398_v63 = vsub.s32 1, %v1896_v27 }
  0x3f   :  { %1506 = vmatprep.subr.bf16.mxu1 %v1815_v18  ;;  %v1664_v24 = vld [vmem:[#allocation7 + $0x250] ss:$8 sps:$4 sm:$0xff]   ;;  %v1665_v25 = vld [vmem:[#allocation7 + $0x260] ss:$8 sps:$4 sm:$0xff]   ;;  %v1637_v39 = vld [vmem:[#allocation7 + $0x84] ss:$8 sps:$4 sm:$0xff]  }
  0x40   :  { %219 = vmatpush1.bf16.msra.mxu0 %v1619_v6  ;;  %v1898_v28 = vld [vmem:[#allocation7 + $0x380] sm:$0xff]  ;;  %v1910_v41 = vld [vmem:[#allocation5] sm:$0xf]  ;;  %v1638_v44 = vld [vmem:[#allocation7 + $0x90] ss:$8 sps:$4 sm:$0xff]  }
  0x41   :  { %220 = vmatprep.subr.bf16.mxu0 %v1620_v7  ;;  %v1901_v29 = vunpack.c.l.bf16 %v1898_v28  ;;  %v1635_v42 = vld [vmem:[#allocation7 + $0x80] ss:$8 sps:$4 sm:$0xff]   ;;  %v1640_v43 = vld [vmem:[#allocation7 + $0x94] ss:$8 sps:$4 sm:$0xff]   ;;  %v1643_v45 = vld [vmem:[#allocation7 + $0xa4] ss:$8 sps:$4 sm:$0xff]   ;;  %v1924_v1 = vunpack.c.h.bf16 %v1898_v28 }
  0x42   :  { %1507 = vmatpush3.bf16.msra.mxu1 %v1660_v20  ;;  %v1641_v46 = vld [vmem:[#allocation7 + $0xa0] ss:$8 sps:$4 sm:$0xff]   ;;  %v1646_v47 = vld [vmem:[#allocation7 + $0xb4] ss:$8 sps:$4 sm:$0xff]   ;;  %v1644_v48 = vld [vmem:[#allocation7 + $0xb0] ss:$8 sps:$4 sm:$0xff]  }
  0x43   :  { %1508 = vmatprep.subr.bf16.mxu1 %v1815_v18  ;;  %v129_v31 = vrot.slane %v1901_v29, %v128_v30  ;;  %v1649_v49 = vld [vmem:[#allocation7 + $0xc4] ss:$8 sps:$4 sm:$0xff]   ;;  %v1647_v50 = vld [vmem:[#allocation7 + $0xc0] ss:$8 sps:$4 sm:$0xff]   ;;  %v1652_v51 = vld [vmem:[#allocation7 + $0xd4] ss:$8 sps:$4 sm:$0xff]   ;;  %v399_v2 = vrot.slane %v1901_v29, %v398_v63  ;;  %v403_v3 = vrot.slane %v1924_v1, %v398_v63 }
  0x44   :  { %221 = vmatpush1.bf16.msra.mxu0 %v1622_v8  ;;  %v1650_v52 = vld [vmem:[#allocation7 + $0xd0] ss:$8 sps:$4 sm:$0xff]   ;;  %v1655_v53 = vld [vmem:[#allocation7 + $0xe4] ss:$8 sps:$4 sm:$0xff]   ;;  %v1653_v54 = vld [vmem:[#allocation7 + $0xe0] ss:$8 sps:$4 sm:$0xff]  }
  0x45   :  { %222 = vmatprep.subr.bf16.mxu0 %v1623_v9  ;;  %v1658_v55 = vld [vmem:[#allocation7 + $0xf4] ss:$8 sps:$4 sm:$0xff]   ;;  %v1656_v56 = vld [vmem:[#allocation7 + $0xf0] ss:$8 sps:$4 sm:$0xff]   ;;  %v1671_v19 = vld [vmem:[#allocation7 + $0x2c0] ss:$8 sps:$4 sm:$0xff]  }
  0x46   :  { %1509 = vmatpush3.bf16.msra.mxu1 %v1661_v21  ;;  %v1666_v57 = vld [vmem:[#allocation7 + $0x270] ss:$8 sps:$4 sm:$0xff]   ;;  %v1673_v21 = vld [vmem:[#allocation7 + $0x2e0] ss:$8 sps:$4 sm:$0xff]  }
  0x47   :  { %1510 = vmatprep.subr.bf16.mxu1 %v1815_v18  ;;  %v1672_v20 = vld [vmem:[#allocation7 + $0x2d0] ss:$8 sps:$4 sm:$0xff]   ;;  %v1949_v26 = vld [vmem:[#allocation7 + $0x180] sm:$0xff]  ;;  %v1951_v28 = vld [vmem:[#allocation7 + $0x188] sm:$0xff] }
  0x48   :  { %223 = vmatpush1.bf16.msra.mxu0 %v1625_v10 }
  0x49   :  { %224 = vmatprep.subr.bf16.mxu0 %v1626_v11 }
  0x4a   :  { %1511 = vmatpush3.bf16.msra.mxu1 %v1662_v22  ;;  %v1674_v22 = vld [vmem:[#allocation7 + $0x2f0] ss:$8 sps:$4 sm:$0xff]  }
  0x4b   :  { %1512 = vmatprep.subr.bf16.mxu1 %v1815_v18 }
  0x4c   :  { %225 = vmatpush1.bf16.msra.mxu0 %v1628_v12 }
  0x4d   :  { %226 = vmatprep.subr.bf16.mxu0 %v1629_v13  ;;  %v58_v13 = vld [vmem:[%s2234_s2] sm:$0xf]  ;;  %s1817_s2 = smov [#allocation8]  }
  0x4e   :  { %1513 = vmatpush3.bf16.msra.mxu1 %v1663_v23  ;;  %v1943_v23 = vld [vmem:[#allocation7 + $0x100] sm:$0xff]  ;;  %s1352_s26 = sshll.u32 %s1817_s2, 4  ;;  %s1353_s26 = int_to_ptr.vmem [resolvable:$true] %s1352_s26 }
  0x4f   :  { %1514 = vmatprep.subr.bf16.mxu1 %v1815_v18  ;;  %s1781_s27 = scalar_lea.vmem %s1353_s26, 256  ;;  %p1786_p11 = scmp.lt.s32.totalorder %s1353_s26, %s1353_s26 }
  0x50   :  { %227 = vmatpush1.bf16.msra.mxu0 %v1631_v14  ;;  %v1667_v14 = vld [vmem:[#allocation7 + $0x280] ss:$8 sps:$4 sm:$0xff]   ;;  %p1782_p10 = scmp.ne.s32.totalorder %s1353_s26, %s1781_s27  ;;  %p1787_p12 = scmp.lt.s32.totalorder %s1781_s27, %s1781_s27 }
  0x51   :  { %228 = vmatprep.subr.bf16.mxu0 %v1632_v15  ;;  %v1668_v15 = vld [vmem:[#allocation7 + $0x290] ss:$8 sps:$4 sm:$0xff]  }
  0x52   :  { %1515 = vmatpush3.bf16.msra.mxu1 %v1664_v24  ;;  %v1945_v24 = vld [vmem:[#allocation7 + $0x108] sm:$0xff]  ;;  %p1788_p13 = por %p1787_p12, %p1786_p11 }
  0x53   :  { %1516 = vmatprep.subr.bf16.mxu1 %v1815_v18 }
  0x54   :  { %229 = vmatpush1.bf16.msra.mxu0 %v1634_v16  ;;  %v1669_v16 = vld [vmem:[#allocation7 + $0x2a0] ss:$8 sps:$4 sm:$0xff]   ;;  %p1789_p0 = pnand %p1788_p13, %p1782_p10 }
  0x55   :  { %1498 = vmatprep.subr.bf16.mxu0 %v1815_v18 }
  0x56   :  { %1517 = vmatpush3.bf16.msra.mxu1 %v1665_v25  ;;  %v1429_v25 = vcombine.high %v1943_v23, %v1945_v24 }
  0x57   :  { %247 = vmatmul.mubr.bf16.vlgmr.msra.gmra.mrb[0].mxu0 %v1880_v17  ;;  %1518 = vmatprep.subr.bf16.mxu1 %v1815_v18 }
  0x58   :  { %1500 = vmatprep.mubr.msk.bf16.mxu0 %vm1816_vm0, %v1815_v18 }
  0x5a   :  { %1519 = vmatpush3.bf16.msra.mxu1 %v1666_v57 }
  0x5b   :  { %1530 = vmatprep.subr.bf16.mxu1 %v1815_v18 }
 0x12a   :  { %v248_v32 = vpop.f32.mrb[0].mxu0 }
 0x12b   :  { %v249_v33 = vadd.f32 %v248_v32, %v129_v31  ;;  %v1907_v34 = vpop.f32.mrb[1].mxu0  ;;  %v1953_v31 = vld [vmem:[#allocation7 + $0x190] sm:$0xff]  ;;  %v1413_v32 = vcombine.high %v1949_v26, %v1951_v28 }
 0x12c   :  { %v252_v35 = vpop.f32.mrb[2].mxu0 }
 0x12d   :  { %v255_v36 = vmax.f32 %v249_v33, 0.0  ;;  %v253_v37 = vpop.f32.mrb[3].mxu0  ;;  %v1412_v33 = vcombine.low %v1949_v26, %v1951_v28  ;;  %v1959_v35 = vld [vmem:[#allocation7 + $0x198] sm:$0xff] }
 0x12e   :  { %v1963_v37 = vld [vmem:[#allocation7 + $0x1a0] sm:$0xff] }
 0x12f   :  { %v256_v38 = vpack.c.bf16 %v255_v36, %v255_v36  ;;  %v1415_v36 = vcombine.high %v1953_v31, %v1959_v35 }
 0x131   :  { %v263_v40 = vsel %vm261_vm1, %v256_v38, 0  ;;  %v1965_v38 = vld [vmem:[#allocation7 + $0x1a8] sm:$0xff] }
 0x132   :  { %1499 = vmatpush3.bf16.msra.mxu0 %v263_v40  ;;  %v1417_v40 = vcombine.high %v1963_v37, %v1965_v38 }
 0x133   :  { %484 = vmatprep.subr.bf16.mxu0 %v1637_v39  ;;  %v1414_v39 = vcombine.low %v1953_v31, %v1959_v35 }
 0x135   :  { %1501 = vmatmul.mubr.msk.bf16.vlgmr.msra.gmra.mrb[4].mxu0 %vm257_vm2, %v1910_v41 }
 0x136   :  { %485 = vmatpush1.bf16.msra.mxu0 %v1635_v42  ;;  %516 = vmatprep.mubr.bf16.mxu0 %v1814_v0  ;;  %v1971_v42 = vld [vmem:[#allocation7 + $0x1b0] sm:$0xff] }
 0x137   :  { %486 = vmatprep.subr.bf16.mxu0 %v1640_v43  ;;  %v1973_v43 = vld [vmem:[#allocation7 + $0x1b8] sm:$0xff] }
 0x13a   :  { %487 = vmatpush1.bf16.msra.mxu0 %v1638_v44  ;;  %v1416_v44 = vcombine.low %v1963_v37, %v1965_v38 }
 0x13b   :  { %488 = vmatprep.subr.bf16.mxu0 %v1643_v45  ;;  %v1419_v45 = vcombine.high %v1971_v42, %v1973_v43 }
 0x13e   :  { %489 = vmatpush1.bf16.msra.mxu0 %v1641_v46  ;;  %v1979_v46 = vld [vmem:[#allocation7 + $0x1c0] sm:$0xff] }
 0x13f   :  { %490 = vmatprep.subr.bf16.mxu0 %v1646_v47  ;;  %v1981_v47 = vld [vmem:[#allocation7 + $0x1c8] sm:$0xff] }
 0x142   :  { %491 = vmatpush1.bf16.msra.mxu0 %v1644_v48  ;;  %v1418_v48 = vcombine.low %v1971_v42, %v1973_v43 }
 0x143   :  { %492 = vmatprep.subr.bf16.mxu0 %v1649_v49  ;;  %v1421_v49 = vcombine.high %v1979_v46, %v1981_v47 }
 0x146   :  { %493 = vmatpush1.bf16.msra.mxu0 %v1647_v50  ;;  %v1987_v50 = vld [vmem:[#allocation7 + $0x1d0] sm:$0xff] }
 0x147   :  { %494 = vmatprep.subr.bf16.mxu0 %v1652_v51  ;;  %v1989_v51 = vld [vmem:[#allocation7 + $0x1d8] sm:$0xff] }
 0x14a   :  { %495 = vmatpush1.bf16.msra.mxu0 %v1650_v52  ;;  %v1420_v52 = vcombine.low %v1979_v46, %v1981_v47 }
 0x14b   :  { %496 = vmatprep.subr.bf16.mxu0 %v1655_v53  ;;  %v1423_v53 = vcombine.high %v1987_v50, %v1989_v51 }
 0x14e   :  { %497 = vmatpush1.bf16.msra.mxu0 %v1653_v54  ;;  %v1995_v54 = vld [vmem:[#allocation7 + $0x1e0] sm:$0xff] }
 0x14f   :  { %498 = vmatprep.subr.bf16.mxu0 %v1658_v55  ;;  %v1997_v55 = vld [vmem:[#allocation7 + $0x1e8] sm:$0xff] }
 0x150   :  { %v1425_v57 = vcombine.high %v1995_v54, %v1997_v55 }
 0x152   :  { %499 = vmatpush1.bf16.msra.mxu0 %v1656_v56  ;;  %v1422_v56 = vcombine.low %v1987_v50, %v1989_v51 }
 0x153   :  { %1524 = vmatprep.subr.bf16.mxu0 %v1815_v18 }
 0x155   :  { %517 = vmatmul.mubr.bf16.vlgmr.msra.gmra.mrb[8].mxu0 %v1880_v17  ;;  %v1670_v17 = vld [vmem:[#allocation7 + $0x2b0] ss:$8 sps:$4 sm:$0xff]  }
 0x156   :  { %1526 = vmatprep.mubr.msk.bf16.mxu0 %vm1816_vm0, %v1815_v18 }
 0x208   :  { %v299_v58 = vpop.f32.mrb[4].mxu0 }
 0x209   :  { %v305_v59 = vpack.c.bf16 %v299_v58, %v299_v58  ;;  %v1502_v60 = vpop.f32.mrb[5].mxu0  ;;  %v133_v58 = vrot.slane %v1924_v1, %v128_v30 }
 0x20a   :  { %v302_v61 = vpop.f32.mrb[6].mxu0 }
 0x20b   :  { %v1503_v62 = vpop.f32.mrb[7].mxu0  ;;  %1521 = vmatmul.mubr.bf16.vlgmr.msra.gmra.mrb[0].mxu1 %v305_v59  ;;  %v251_v59 = vadd.f32 %v1907_v34, %v133_v58  ;;  %v2015_v34 = vld [vmem:[#allocation7 + $0x120] sm:$0xff] }
 0x20c   :  { %1546 = vmatprep.mubr.msk.bf16.mxu1 %vm1816_vm0, %v1815_v18  ;;  %1531 = vmatpush3.bf16.msra.mxu1 %v1667_v14 }
 0x20d   :  { %1532 = vmatprep.subr.bf16.mxu1 %v1815_v18 }
 0x210   :  { %1533 = vmatpush3.bf16.msra.mxu1 %v1668_v15  ;;  %v2024_v15 = vld [vmem:[#allocation7 + $0x130] sm:$0xff] }
 0x211   :  { %1534 = vmatprep.subr.bf16.mxu1 %v1815_v18 }
 0x214   :  { %1535 = vmatpush3.bf16.msra.mxu1 %v1669_v16  ;;  %v2026_v16 = vld [vmem:[#allocation7 + $0x138] sm:$0xff] }
 0x215   :  { %1536 = vmatprep.subr.bf16.mxu1 %v1815_v18 }
 0x218   :  { %1537 = vmatpush3.bf16.msra.mxu1 %v1670_v17 }
 0x219   :  { %1538 = vmatprep.subr.bf16.mxu1 %v1815_v18 }
 0x21c   :  { %1539 = vmatpush3.bf16.msra.mxu1 %v1671_v19  ;;  %v1435_v19 = vcombine.high %v2024_v15, %v2026_v16 }
 0x21d   :  { %1540 = vmatprep.subr.bf16.mxu1 %v1815_v18 }
 0x220   :  { %1541 = vmatpush3.bf16.msra.mxu1 %v1672_v20  ;;  %v2032_v20 = vld [vmem:[#allocation7 + $0x140] sm:$0xff] }
 0x221   :  { %1542 = vmatprep.subr.bf16.mxu1 %v1815_v18 }
 0x224   :  { %1543 = vmatpush3.bf16.msra.mxu1 %v1673_v21  ;;  %v2034_v21 = vld [vmem:[#allocation7 + $0x148] sm:$0xff] }
 0x225   :  { %1544 = vmatprep.subr.bf16.mxu1 %v1815_v18 }
 0x228   :  { %v518_v4 = vpop.f32.mrb[8].mxu0  ;;  %1545 = vmatpush3.bf16.msra.mxu1 %v1674_v22  ;;  %v1434_v22 = vcombine.low %v2024_v15, %v2026_v16 }
 0x229   :  { %v519_v5 = vadd.f32 %v518_v4, %v399_v2  ;;  %v520_v6 = vpop.f32.mrb[9].mxu0  ;;  %923 = vmatprep.subr.bf16.mxu1 %v1429_v25  ;;  %v2009_v4 = vld [vmem:[#allocation7 + $0x118] sm:$0xff]  ;;  %v1437_v25 = vcombine.high %v2032_v20, %v2034_v21 }
 0x22a   :  { %v1928_v7 = vadd.f32 %v520_v6, %v403_v3  ;;  %v522_v8 = vpop.f32.mrb[10].mxu0  ;;  %v2007_v3 = vld [vmem:[#allocation7 + $0x110] sm:$0xff]  ;;  %v1428_v6 = vcombine.low %v1943_v23, %v1945_v24 }
 0x22b   :  { %v525_v9 = vmax.f32 %v519_v5, 0.0  ;;  %v523_v10 = vpop.f32.mrb[11].mxu0  ;;  %v1431_v30 = vcombine.high %v2007_v3, %v2009_v4 }
 0x22d   :  { %v526_v11 = vpack.c.bf16 %v525_v9, %v525_v9 }
 0x22f   :  { %v531_v12 = vsel %vm261_vm1, %v526_v11, 0  ;;  %v2017_v11 = vld [vmem:[#allocation7 + $0x128] sm:$0xff] }
 0x230   :  { %1525 = vmatpush3.bf16.msra.mxu0 %v531_v12  ;;  %v1433_v14 = vcombine.high %v2015_v34, %v2017_v11  ;;  %v1432_v17 = vcombine.low %v2015_v34, %v2017_v11 }
 0x231   :  { %802 = vmatprep.subr.bf16.mxu0 %v1413_v32  ;;  %v2040_v32 = vld [vmem:[#allocation7 + $0x150] sm:$0xff] }
 0x233   :  { %1527 = vmatmul.mubr.msk.bf16.vlgmr.msra.gmra.mrb[12].mxu0 %vm257_vm2, %v58_v13  ;;  %v1430_v13 = vcombine.low %v2007_v3, %v2009_v4 }
 0x234   :  { %834 = vmatprep.mubr.bf16.mxu0 %v1814_v0  ;;  %803 = vmatpush1.bf16.msra.mxu0 %v1412_v33  ;;  %v2042_v33 = vld [vmem:[#allocation7 + $0x158] sm:$0xff] }
 0x235   :  { %804 = vmatprep.subr.bf16.mxu0 %v1415_v36  ;;  %v1436_v36 = vcombine.low %v2032_v20, %v2034_v21 }
 0x238   :  { %805 = vmatpush1.bf16.msra.mxu0 %v1414_v39  ;;  %v1439_v39 = vcombine.high %v2040_v32, %v2042_v33 }
 0x239   :  { %806 = vmatprep.subr.bf16.mxu0 %v1417_v40  ;;  %v2048_v40 = vld [vmem:[#allocation7 + $0x160] sm:$0xff] }
 0x23c   :  { %807 = vmatpush1.bf16.msra.mxu0 %v1416_v44  ;;  %v2050_v44 = vld [vmem:[#allocation7 + $0x168] sm:$0xff] }
 0x23d   :  { %808 = vmatprep.subr.bf16.mxu0 %v1419_v45  ;;  %v1438_v45 = vcombine.low %v2040_v32, %v2042_v33 }
 0x240   :  { %809 = vmatpush1.bf16.msra.mxu0 %v1418_v48  ;;  %v1441_v48 = vcombine.high %v2048_v40, %v2050_v44 }
 0x241   :  { %810 = vmatprep.subr.bf16.mxu0 %v1421_v49  ;;  %v2056_v49 = vld [vmem:[#allocation7 + $0x170] sm:$0xff] }
 0x244   :  { %811 = vmatpush1.bf16.msra.mxu0 %v1420_v52  ;;  %v2058_v52 = vld [vmem:[#allocation7 + $0x178] sm:$0xff] }
 0x245   :  { %812 = vmatprep.subr.bf16.mxu0 %v1423_v53  ;;  %v1440_v53 = vcombine.low %v2048_v40, %v2050_v44 }
 0x248   :  { %813 = vmatpush1.bf16.msra.mxu0 %v1422_v56  ;;  %v1443_v56 = vcombine.high %v2056_v49, %v2058_v52 }
 0x249   :  { %814 = vmatprep.subr.bf16.mxu0 %v1425_v57  ;;  %v1442_v57 = vcombine.low %v2056_v49, %v2058_v52 }
 0x2de   :  { %v388_v60 = vpop.f32.mrb[0].mxu1 }
 0x2df   :  { %v394_v61 = vadd.f32 %v388_v60, %v251_v59  ;;  %v1522_v62 = vpop.f32.mrb[1].mxu1  ;;  %v1424_v60 = vcombine.low %v1995_v54, %v1997_v55 }
 0x2e0   :  { %v391_v63 = vpop.f32.mrb[2].mxu1  ;;  %v2069_v62 = vld [vmem:[#allocation7 + $0x1f0] sm:$0xff] }
 0x2e1   :  { %v1523_v2 = vpop.f32.mrb[3].mxu1  ;;  %v395_v58 = vmax.f32 %v394_v61, 0.0  ;;  %815 = vmatpush1.bf16.msra.mxu0 %v1424_v60  ;;  %v2071_v63 = vld [vmem:[#allocation7 + $0x1f8] sm:$0xff]  ;;  %v2103_v60 = vld [vmem:[#allocation7 + $0x320] ss:$8 sps:$4 sm:$0xff]  }
 0x2e2   :  { %v1427_v2 = vcombine.high %v2069_v62, %v2071_v63  ;;  %v1426_v61 = vcombine.low %v2069_v62, %v2071_v63 }
 0x2e3   :  { %v720_v59 = vpack.c.bf16 %v395_v58, %v395_v58 }
 0x2e4   :  { %816 = vmatprep.subr.bf16.mxu0 %v1427_v2  ;;  %v2107_v2 = vld [vmem:[#allocation7 + $0x330] ss:$8 sps:$4 sm:$0xff]  }
 0x2e5   :  { %817 = vmatpush1.bf16.msra.mxu0 %v1426_v61  ;;  %v2111_v61 = vld [vmem:[#allocation7 + $0x340] ss:$8 sps:$4 sm:$0xff]  }
 0x2e6   :  { %1550 = vmatprep.subr.bf16.mxu0 %v1815_v18 }
 0x306   :  { %v567_v5 = vpop.f32.mrb[12].mxu0 }
 0x307   :  { %v573_v8 = vpack.c.bf16 %v567_v5, %v567_v5  ;;  %v1528_v9 = vpop.f32.mrb[13].mxu0 }
 0x308   :  { %v570_v10 = vpop.f32.mrb[14].mxu0 }
 0x309   :  { %v1529_v12 = vpop.f32.mrb[15].mxu0  ;;  %1547 = vmatmul.mubr.bf16.vlgmr.msra.gmra.mrb[4].mxu1 %v573_v8 }
 0x30a   :  { %924 = vmatpush1.bf16.msra.mxu1 %v1428_v6  ;;  %955 = vmatprep.mubr.bf16.mxu1 %v1814_v0 }
 0x30b   :  { %925 = vmatprep.subr.bf16.mxu1 %v1431_v30 }
 0x30e   :  { %926 = vmatpush1.bf16.msra.mxu1 %v1430_v13 }
 0x30f   :  { %927 = vmatprep.subr.bf16.mxu1 %v1433_v14 }
 0x312   :  { %928 = vmatpush1.bf16.msra.mxu1 %v1432_v17 }
 0x313   :  { %929 = vmatprep.subr.bf16.mxu1 %v1435_v19  ;;  %v714_v19 = vsub.s32 2, %v1896_v27 }
 0x316   :  { %930 = vmatpush1.bf16.msra.mxu1 %v1434_v22  ;;  %v2085_v22 = vrot.slane %v1901_v29, %v714_v19  ;;  %v2097_v29 = vld [vmem:[#allocation7 + $0x310] ss:$8 sps:$4 sm:$0xff]  }
 0x317   :  { %931 = vmatprep.subr.bf16.mxu1 %v1437_v25 }
 0x31a   :  { %932 = vmatpush1.bf16.msra.mxu1 %v1436_v36 }
 0x31b   :  { %933 = vmatprep.subr.bf16.mxu1 %v1439_v39 }
 0x31e   :  { %934 = vmatpush1.bf16.msra.mxu1 %v1438_v45 }
 0x31f   :  { %935 = vmatprep.subr.bf16.mxu1 %v1441_v48 }
 0x322   :  { %936 = vmatpush1.bf16.msra.mxu1 %v1440_v53 }
 0x323   :  { %937 = vmatprep.subr.bf16.mxu1 %v1443_v56 }
 0x326   :  { %938 = vmatpush1.bf16.msra.mxu1 %v1442_v57 }
 0x329   :  { %956 = vmatmul.mubr.bf16.vlgmr.msra.gmra.mrb[8].mxu1 %v720_v59  ;;  %v2091_v59 = vld [vmem:[#allocation7 + $0x300] ss:$8 sps:$4 sm:$0xff]  }
 0x32a   :  { %1247 = vmatprep.mubr.bf16.mxu1 %v1814_v0 }
 0x3dc   :  { %v656_v5 = vpop.f32.mrb[4].mxu1 }
 0x3dd   :  { %v662_v0 = vadd.f32 %v656_v5, %v1928_v7  ;;  %v1548_v6 = vpop.f32.mrb[5].mxu1  ;;  %v2115_v5 = vld [vmem:[#allocation7 + $0x350] ss:$8 sps:$4 sm:$0xff]  }
 0x3de   :  { %v659_v8 = vpop.f32.mrb[6].mxu1  ;;  %v2124_v6 = vld [vmem:[#allocation7 + $0x370] ss:$8 sps:$4 sm:$0xff]  }
 0x3df   :  { %v663_v9 = vmax.f32 %v662_v0, 0.0  ;;  %v1549_v30 = vpop.f32.mrb[7].mxu1  ;;  %v2119_v0 = vld [vmem:[#allocation7 + $0x360] ss:$8 sps:$4 sm:$0xff]   ;;  %v1103_v8 = vunpack.c.h.bf16 %v1943_v23 }
 0x3e0   :  { %v1135_v30 = vunpack.c.h.bf16 %v1949_v26 }
 0x3e1   :  { %v721_v10 = vpack.c.bf16 %v663_v9, %v663_v9  ;;  %v1105_v9 = vunpack.c.h.bf16 %v1945_v24 }
 0x3e3   :  { %835 = vmatmul.mubr.bf16.vlgmr.msra.gmra.mrb[16].mxu0 %v721_v10  ;;  %v1137_v10 = vunpack.c.h.bf16 %v1951_v28 }
 0x3e4   :  { %1552 = vmatprep.mubr.msk.bf16.mxu0 %vm1816_vm0, %v1815_v18 }
 0x3fc   :  { %v957_v12 = vpop.f32.mrb[8].mxu1 }
 0x3fd   :  { %v959_v13 = vpop.f32.mrb[9].mxu1 }
 0x3fe   :  { %v961_v14 = vpop.f32.mrb[10].mxu1 }
 0x3ff   :  { %v962_v17 = vpop.f32.mrb[11].mxu1  ;;  %v1134_v14 = vunpack.c.l.bf16 %v1949_v26  ;;  %v1138_v26 = vunpack.c.l.bf16 %v1953_v31 }
 0x400   :  { %v1136_v17 = vunpack.c.l.bf16 %v1951_v28 }
 0x4b6   :  { %v836_v7 = vpop.f32.mrb[16].mxu0 }
 0x4b7   :  { %v958_v25 = vadd.f32 %v957_v12, %v836_v7  ;;  %v838_v36 = vpop.f32.mrb[17].mxu0  ;;  %v1102_v12 = vunpack.c.l.bf16 %v1943_v23  ;;  %v1167_v7 = vadd.f32 %v1135_v30, %v1103_v8  ;;  %v1106_v23 = vunpack.c.l.bf16 %v2007_v3 }
 0x4b8   :  { %v2087_v39 = vadd.f32 %v959_v13, %v838_v36  ;;  %v840_v45 = vpop.f32.mrb[18].mxu0  ;;  %v1104_v13 = vunpack.c.l.bf16 %v1945_v24  ;;  %v1107_v36 = vunpack.c.h.bf16 %v2007_v3  ;;  %v1108_v24 = vunpack.c.l.bf16 %v2009_v4 }
 0x4b9   :  { %v964_v48 = vadd.f32 %v958_v25, %v2085_v22  ;;  %v841_v53 = vpop.f32.mrb[19].mxu0  ;;  %v1169_v25 = vadd.f32 %v1137_v10, %v1105_v9  ;;  %v1109_v45 = vunpack.c.h.bf16 %v2009_v4  ;;  %v1140_v30 = vunpack.c.l.bf16 %v1959_v35 }
 0x4ba   :  { %v1168_v53 = vadd.f32 %v1136_v17, %v1104_v13  ;;  %v1170_v10 = vadd.f32 %v1138_v26, %v1106_v23  ;;  %v1113_v13 = vunpack.c.h.bf16 %v2017_v11  ;;  %v1145_v4 = vunpack.c.h.bf16 %v1965_v38 }
 0x4bb   :  { %v966_v56 = vmax.f32 %v964_v48, 0.0  ;;  %v1166_v48 = vadd.f32 %v1134_v14, %v1102_v12  ;;  %v1111_v12 = vunpack.c.h.bf16 %v2015_v34  ;;  %v1143_v14 = vunpack.c.h.bf16 %v1963_v37 }
 0x4bc   :  { %v1172_v3 = vadd.f32 %v1140_v30, %v1108_v24  ;;  %v1147_v23 = vunpack.c.h.bf16 %v1971_v42 }
 0x4bd   :  { %v967_v57 = vpack.c.bf16 %v966_v56, %v966_v56  ;;  %v1139_v56 = vunpack.c.h.bf16 %v1953_v31  ;;  %v1198_v28 = vpack.c.bf16 %v1168_v53, %v1166_v48  ;;  %v1110_v31 = vunpack.c.l.bf16 %v2015_v34 }
 0x4be   :  { %v1177_v48 = vadd.f32 %v1145_v4, %v1113_v13  ;;  %v1115_v53 = vunpack.c.h.bf16 %v2024_v15  ;;  %v1149_v34 = vunpack.c.h.bf16 %v1973_v43  ;;  %v1151_v13 = vunpack.c.h.bf16 %v1979_v46 }
 0x4bf   :  { %v969_v58 = vsel %vm261_vm1, %v967_v57, 0  ;;  %v1141_v57 = vunpack.c.h.bf16 %v1959_v35  ;;  %v1171_v8 = vadd.f32 %v1139_v56, %v1107_v36  ;;  %v1142_v35 = vunpack.c.l.bf16 %v1963_v37 }
 0x4c0   :  { %1551 = vmatpush3.bf16.msra.mxu0 %v969_v58  ;;  %v1199_v58 = vpack.c.bf16 %v1169_v25, %v1167_v7  ;;  %v1175_v7 = vadd.f32 %v1143_v14, %v1111_v12  ;;  %v1112_v25 = vunpack.c.l.bf16 %v2017_v11  ;;  %v1144_v36 = vunpack.c.l.bf16 %v1965_v38 }
 0x4c1   :  { %1556 = vmatprep.subr.bf16.mxu0 %v1815_v18  ;;  %v1173_v9 = vadd.f32 %v1141_v57, %v1109_v45  ;;  %v1200_v45 = vpack.c.bf16 %v1172_v3, %v1170_v10  ;;  %v1117_v56 = vunpack.c.h.bf16 %v2026_v16  ;;  %v1174_v57 = vadd.f32 %v1142_v35, %v1110_v31 }
 0x4c2   :  { %1215 = vmatprep.subr.bf16.mxu1 %v1199_v58  ;;  %v1176_v58 = vadd.f32 %v1144_v36, %v1112_v25  ;;  %v1203_v24 = vpack.c.bf16 %v1177_v48, %v1175_v7  ;;  %v1114_v11 = vunpack.c.l.bf16 %v2024_v15  ;;  %v1116_v37 = vunpack.c.l.bf16 %v2026_v16 }
 0x4c3   :  { %1553 = vmatmul.mubr.msk.bf16.vlgmr.msra.gmra.mrb[20].mxu0 %vm257_vm2, %v1910_v41  ;;  %1216 = vmatpush1.bf16.msra.mxu1 %v1198_v28  ;;  %v1201_v17 = vpack.c.bf16 %v1173_v9, %v1171_v8  ;;  %v1146_v38 = vunpack.c.l.bf16 %v1971_v42  ;;  %v1179_v28 = vadd.f32 %v1147_v23, %v1115_v53  ;;  %v1181_v8 = vadd.f32 %v1149_v34, %v1117_v56 }
 0x4c4   :  { %1557 = vmatpush3.bf16.msra.mxu0 %v2091_v59  ;;  %1572 = vmatprep.mubr.msk.bf16.mxu0 %vm1816_vm0, %v1815_v18  ;;  %v1202_v26 = vpack.c.bf16 %v1176_v58, %v1174_v57  ;;  %v1148_v9 = vunpack.c.l.bf16 %v1973_v43  ;;  %v1119_v10 = vunpack.c.h.bf16 %v2032_v20  ;;  %v1121_v12 = vunpack.c.h.bf16 %v2034_v21 }
 0x4c5   :  { %1558 = vmatprep.subr.bf16.mxu0 %v1815_v18  ;;  %1217 = vmatprep.subr.bf16.mxu1 %v1201_v17  ;;  %v1178_v30 = vadd.f32 %v1146_v38, %v1114_v11  ;;  %v1205_v14 = vpack.c.bf16 %v1181_v8, %v1179_v28  ;;  %v1153_v15 = vunpack.c.h.bf16 %v1981_v47  ;;  %v1118_v16 = vunpack.c.l.bf16 %v2032_v20 }
 0x4c6   :  { %v1180_v17 = vadd.f32 %v1148_v9, %v1116_v37  ;;  %v1183_v42 = vadd.f32 %v1151_v13, %v1119_v10  ;;  %v1120_v3 = vunpack.c.l.bf16 %v2034_v21  ;;  %v1150_v43 = vunpack.c.l.bf16 %v1979_v46 }
 0x4c7   :  { %1218 = vmatpush1.bf16.msra.mxu1 %v1200_v45  ;;  %v1152_v4 = vunpack.c.l.bf16 %v1981_v47  ;;  %v1185_v7 = vadd.f32 %v1153_v15, %v1121_v12  ;;  %v1123_v25 = vunpack.c.h.bf16 %v2040_v32  ;;  %v1125_v35 = vunpack.c.h.bf16 %v2042_v33 }
 0x4c8   :  { %1559 = vmatpush3.bf16.msra.mxu0 %v2097_v29  ;;  %1219 = vmatprep.subr.bf16.mxu1 %v1203_v24  ;;  %v1204_v31 = vpack.c.bf16 %v1180_v17, %v1178_v30  ;;  %v1182_v36 = vadd.f32 %v1150_v43, %v1118_v16  ;;  %v1155_v48 = vunpack.c.h.bf16 %v1987_v50  ;;  %v1157_v20 = vunpack.c.h.bf16 %v1989_v51 }
 0x4c9   :  { %1560 = vmatprep.subr.bf16.mxu0 %v1815_v18  ;;  %v1184_v45 = vadd.f32 %v1152_v4, %v1120_v3  ;;  %v1207_v53 = vpack.c.bf16 %v1185_v7, %v1183_v42  ;;  %v1122_v21 = vunpack.c.l.bf16 %v2040_v32  ;;  %v1124_v46 = vunpack.c.l.bf16 %v2042_v33 }
 0x4ca   :  { %v1154_v47 = vunpack.c.l.bf16 %v1987_v50  ;;  %v1187_v57 = vadd.f32 %v1155_v48, %v1123_v25  ;;  %v1189_v58 = vadd.f32 %v1157_v20, %v1125_v35  ;;  %v1156_v23 = vunpack.c.l.bf16 %v1989_v51 }
 0x4cb   :  { %1220 = vmatpush1.bf16.msra.mxu1 %v1202_v26  ;;  %v1206_v56 = vpack.c.bf16 %v1184_v45, %v1182_v36  ;;  %v1127_v24 = vunpack.c.h.bf16 %v2048_v40  ;;  %v1129_v11 = vunpack.c.h.bf16 %v2050_v44  ;;  %v1159_v37 = vunpack.c.h.bf16 %v1995_v54 }
 0x4cc   :  { %1561 = vmatpush3.bf16.msra.mxu0 %v2103_v60  ;;  %1221 = vmatprep.subr.bf16.mxu1 %v1205_v14  ;;  %v1186_v34 = vadd.f32 %v1154_v47, %v1122_v21  ;;  %v1209_v38 = vpack.c.bf16 %v1189_v58, %v1187_v57  ;;  %v1188_v32 = vadd.f32 %v1156_v23, %v1124_v46  ;;  %v1161_v33 = vunpack.c.h.bf16 %v1997_v55 }
 0x4cd   :  { %1562 = vmatprep.subr.bf16.mxu0 %v1815_v18  ;;  %v1191_v26 = vadd.f32 %v1159_v37, %v1127_v24  ;;  %v1126_v13 = vunpack.c.l.bf16 %v2048_v40  ;;  %v1128_v14 = vunpack.c.l.bf16 %v2050_v44  ;;  %v1158_v17 = vunpack.c.l.bf16 %v1995_v54 }
 0x4ce   :  { %v1208_v50 = vpack.c.bf16 %v1188_v32, %v1186_v34  ;;  %v1193_v28 = vadd.f32 %v1161_v33, %v1129_v11  ;;  %v1160_v15 = vunpack.c.l.bf16 %v1997_v55  ;;  %v1131_v3 = vunpack.c.h.bf16 %v2056_v49 }
 0x4cf   :  { %1222 = vmatpush1.bf16.msra.mxu1 %v1204_v31  ;;  %v1190_v16 = vadd.f32 %v1158_v17, %v1126_v13  ;;  %v1133_v43 = vunpack.c.h.bf16 %v2058_v52  ;;  %v1163_v4 = vunpack.c.h.bf16 %v2069_v62  ;;  %v1165_v31 = vunpack.c.h.bf16 %v2071_v63 }
 0x4d0   :  { %1563 = vmatpush3.bf16.msra.mxu0 %v2107_v2  ;;  %1223 = vmatprep.subr.bf16.mxu1 %v1207_v53  ;;  %v1211_v8 = vpack.c.bf16 %v1193_v28, %v1191_v26  ;;  %v1192_v42 = vadd.f32 %v1160_v15, %v1128_v14  ;;  %v1130_v25 = vunpack.c.l.bf16 %v2056_v49  ;;  %v1132_v40 = vunpack.c.l.bf16 %v2058_v52 }
 0x4d1   :  { %1564 = vmatprep.subr.bf16.mxu0 %v1815_v18  ;;  %v1162_v44 = vunpack.c.l.bf16 %v2069_v62  ;;  %v1195_v54 = vadd.f32 %v1163_v4, %v1131_v3  ;;  %v1197_v35 = vadd.f32 %v1165_v31, %v1133_v43  ;;  %v1164_v55 = vunpack.c.l.bf16 %v2071_v63 }
 0x4d2   :  { %v1210_v7 = vpack.c.bf16 %v1192_v42, %v1190_v16  ;;  %v719_v49 = vrot.slane %v1924_v1, %v714_v19 }
 0x4d3   :  { %1224 = vmatpush1.bf16.msra.mxu1 %v1206_v56  ;;  %v1194_v36 = vadd.f32 %v1162_v44, %v1130_v25  ;;  %v1213_v45 = vpack.c.bf16 %v1197_v35, %v1195_v54  ;;  %v1196_v48 = vadd.f32 %v1164_v55, %v1132_v40 }
 0x4d4   :  { %1565 = vmatpush3.bf16.msra.mxu0 %v2111_v61  ;;  %1225 = vmatprep.subr.bf16.mxu1 %v1209_v38  ;;  %v965_v52 = vadd.f32 %v2087_v39, %v719_v49 }
 0x4d5   :  { %1566 = vmatprep.subr.bf16.mxu0 %v1815_v18  ;;  %v1212_v20 = vpack.c.bf16 %v1196_v48, %v1194_v36 }
 0x4d7   :  { %1226 = vmatpush1.bf16.msra.mxu1 %v1208_v50 }
 0x4d8   :  { %1567 = vmatpush3.bf16.msra.mxu0 %v2115_v5  ;;  %1227 = vmatprep.subr.bf16.mxu1 %v1211_v8 }
 0x4d9   :  { %1568 = vmatprep.subr.bf16.mxu0 %v1815_v18 }
 0x4db   :  { %1228 = vmatpush1.bf16.msra.mxu1 %v1210_v7 }
 0x4dc   :  { %1569 = vmatpush3.bf16.msra.mxu0 %v2119_v0  ;;  %1229 = vmatprep.subr.bf16.mxu1 %v1213_v45 }
 0x4dd   :  { %1570 = vmatprep.subr.bf16.mxu0 %v1815_v18 }
 0x4df   :  { %1230 = vmatpush1.bf16.msra.mxu1 %v1212_v20 }
 0x4e0   :  { %1571 = vmatpush3.bf16.msra.mxu0 %v2124_v6  ;;  %1582 = vmatprep.subr.bf16.mxu1 %v1815_v18 }
 0x4e1   :  { %1576 = vmatprep.subr.bf16.mxu0 %v1815_v18 }
 0x596   :  { %v1005_v51 = vpop.f32.mrb[20].mxu0 }
 0x597   :  { %v1011_v9 = vpack.c.bf16 %v1005_v51, %v1005_v51  ;;  %v1554_v30 = vpop.f32.mrb[21].mxu0 }
 0x598   :  { %v1008_v10 = vpop.f32.mrb[22].mxu0 }
 0x599   :  { %v1555_v12 = vpop.f32.mrb[23].mxu0  ;;  %1573 = vmatmul.mubr.bf16.vlgmr.msra.gmra.mrb[24].mxu0 %v1011_v9 }
 0x59a   :  { %1578 = vmatprep.mubr.msk.bf16.mxu0 %vm1816_vm0, %v1815_v18 }
 0x66c   :  { %v1094_v62 = vpop.f32.mrb[24].mxu0 }
 0x66d   :  { %v1100_v53 = vadd.f32 %v1094_v62, %v965_v52  ;;  %v1574_v21 = vpop.f32.mrb[25].mxu0 }
 0x66e   :  { %v1097_v46 = vpop.f32.mrb[26].mxu0 }
 0x66f   :  { %v1101_v63 = vmax.f32 %v1100_v53, 0.0  ;;  %v1575_v47 = vpop.f32.mrb[27].mxu0 }
 0x671   :  { %v1214_v56 = vpack.c.bf16 %v1101_v63, %v1101_v63 }
 0x673   :  { %1248 = vmatmul.mubr.bf16.vlgmr.msra.gmra.mrb[12].mxu1 %v1214_v56 }
 0x674   :  { %1583 = vmatpush3.bf16.msra.mxu1 %v2091_v59  ;;  %1598 = vmatprep.mubr.msk.bf16.mxu1 %vm1816_vm0, %v1815_v18 }
 0x675   :  { %1584 = vmatprep.subr.bf16.mxu1 %v1815_v18 }
 0x678   :  { %1585 = vmatpush3.bf16.msra.mxu1 %v2097_v29 }
 0x679   :  { %1586 = vmatprep.subr.bf16.mxu1 %v1815_v18 }
 0x67c   :  { %1587 = vmatpush3.bf16.msra.mxu1 %v2103_v60 }
 0x67d   :  { %1588 = vmatprep.subr.bf16.mxu1 %v1815_v18 }
 0x680   :  { %1589 = vmatpush3.bf16.msra.mxu1 %v2107_v2 }
 0x681   :  { %1590 = vmatprep.subr.bf16.mxu1 %v1815_v18 }
 0x684   :  { %1591 = vmatpush3.bf16.msra.mxu1 %v2111_v61 }
 0x685   :  { %1592 = vmatprep.subr.bf16.mxu1 %v1815_v18 }
 0x688   :  { %1593 = vmatpush3.bf16.msra.mxu1 %v2115_v5 }
 0x689   :  { %1594 = vmatprep.subr.bf16.mxu1 %v1815_v18 }
 0x68c   :  { %1595 = vmatpush3.bf16.msra.mxu1 %v2119_v0 }
 0x68d   :  { %1596 = vmatprep.subr.bf16.mxu1 %v1815_v18 }
 0x690   :  { %1597 = vmatpush3.bf16.msra.mxu1 %v2124_v6 }
 0x746   :  { %v1249_v27 = vpop.f32.mrb[12].mxu1 }
 0x747   :  { %v1250_v1 = vadd.f32 %v1249_v27, %v2085_v22  ;;  %v1251_v19 = vpop.f32.mrb[13].mxu1 }
 0x748   :  { %v1253_v39 = vpop.f32.mrb[14].mxu1  ;;  %v1252_v57 = vadd.f32 %v1251_v19, %v719_v49 }
 0x749   :  { %v1256_v59 = vmax.f32 %v1250_v1, 0.0  ;;  %v1254_v29 = vpop.f32.mrb[15].mxu1 }
 0x74b   :  { %v1257_v60 = vpack.c.bf16 %v1256_v59, %v1256_v59 }
 0x74d   :  { %v1259_v2 = vsel %vm261_vm1, %v1257_v60, 0 }
 0x74e   :  { %1577 = vmatpush3.bf16.msra.mxu0 %v1259_v2 }
 0x751   :  { %1579 = vmatmul.mubr.msk.bf16.vlgmr.msra.gmra.mrb[28].mxu0 %vm257_vm2, %v1910_v41 }
 0x824   :  { %v1295_v61 = vpop.f32.mrb[28].mxu0 }
 0x825   :  { %v1301_v5 = vpack.c.bf16 %v1295_v61, %v1295_v61  ;;  %v1580_v0 = vpop.f32.mrb[29].mxu0 }
 0x826   :  { %v1298_v18 = vpop.f32.mrb[30].mxu0 }
 0x827   :  { %1599 = vmatmul.mubr.bf16.vlgmr.msra.gmra.mrb[16].mxu1 %v1301_v5  ;;  %v1581_v6 = vpop.f32.mrb[31].mxu0 }
 0x8fa   :  { %v1336_v58 = vpop.f32.mrb[16].mxu1 }
 0x8fb   :  { %v1342_v22 = vadd.f32 %v1336_v58, %v1252_v57  ;;  %v1600_v23 = vpop.f32.mrb[17].mxu1 }
 0x8fc   :  { %v1339_v34 = vpop.f32.mrb[18].mxu1 }
 0x8fd   :  { %v1343_v24 = vmax.f32 %v1342_v22, 0.0  ;;  %v1601_v11 = vpop.f32.mrb[19].mxu1 }
 0x8ff   :  { %1344 = vst [vmem:[#allocation8] sm:$0xff] %v1343_v24  ;;  %1345 = vst [vmem:[#allocation8 + $0x8] sm:$0xff] %v1343_v24 }
 0x900   :  { %1792 = shalt.err (!%p1789_p0)
}
 0x901   :  { %s1793_s30 = scalar_lea.hbm %s2236_s4, 256 }
 0x902   :  { %p1794_p1 = scmp.ne.s32.totalorder %s2236_s4, %s1793_s30  ;;  %p1797_p2 = scmp.lt.u32.totalorder %s1793_s30, %s2236_s4 }
 0x904   :  { %p1799_p3 = pnand %p1797_p2, %p1794_p1 }
 0x906   :  { %1802 = shalt.err (!%p1799_p3)
}
 0x907   :  { %1355 = dma.vmem_to_hbm [thread:$0]  %s1353_s26, 256, %s2236_s4, [#allocation4]  }
 0x908   :  { %1807 = dma.done.wait [#allocation4], 256  }
 0x909   :  { %1808 = vsyncadd [#allocation4], 4294967040 }
 0x90a   :  { %1359 = vsyncpa [#allocation3], 1 }
 0x90b   :  { %1360 = vsyncpa [#allocation6], 1 }
 0x90c   :  { %1361 = vsyncpa [#allocation4], 1 }

</bundles_post_ra>
